<compile_context>
chip_gen: v5e
topology: v5e:2x2
jax: 0.10.0
libtpu: 0.0.40
codegen_flags: <defaults>
</compile_context>

<pallas_src>
import jax
import jax.numpy as jnp
from jax.experimental import pallas as pl
from jax.experimental.pallas import tpu as pltpu
from jax.scipy.special import logsumexp

_SUBLANES = 8
_LANES = 128


def weighted_cross_entropy_loss(outputs, labels, weights, *,
                                target_tile_bytes=4 * 1024 * 1024,
                                max_chunk_bytes=512 * 1024):
    """outputs: (N, C) float logits (f32/bf16); labels: (N,) int; weights: (N,) float."""
    n, c = outputs.shape
    itemsize = jnp.dtype(outputs.dtype).itemsize

    # ---- class-chunk width (lane axis). Single chunk unless a row is very wide. ----
    if c * itemsize <= max_chunk_bytes:
        tile_c = c                                              # full class dim in one block
    else:
        tile_c = max(_LANES, (max_chunk_bytes // itemsize) // _LANES * _LANES)
    num_c_chunks = pl.cdiv(c, tile_c)

    # ---- batch tile: capped by bytes only, multiple of 8 sublanes, <= ceil(N, 8). ----
    row_chunk_bytes = tile_c * itemsize
    tile_n = max(_SUBLANES,
                 (target_tile_bytes // row_chunk_bytes) // _SUBLANES * _SUBLANES)
    n_ceil = pl.cdiv(n, _SUBLANES) * _SUBLANES
    tile_n = min(tile_n, n_ceil)
    num_tiles = pl.cdiv(n, tile_n)

    needs_row_mask = (n % tile_n) != 0      # ragged last batch tile -> mask garbage rows
    needs_col_mask = (c % tile_c) != 0      # ragged last class chunk -> mask garbage cols
    last_chunk = num_c_chunks - 1

    # Labels + weights packed into one (N, 2) f32 side input (one DMA per grid step).
    # Label values are exactly representable in f32 for any realistic class count.
    aux = jnp.stack([weights.astype(jnp.float32), labels.astype(jnp.float32)], axis=1)

    def kernel(logits_ref, aux_ref, out_ref, m_sc, l_sc, p_sc):
        i = pl.program_id(0)     # batch tile        (parallel)
        j = pl.program_id(1)     # class chunk       (arbitrary / accumulated)

        @pl.when(j == 0)
        def _init():
            m_sc[...] = jnp.full_like(m_sc, -jnp.inf)   # running row max
            l_sc[...] = jnp.zeros_like(l_sc)            # running sum(exp(x - m))
            p_sc[...] = jnp.full_like(p_sc, -jnp.inf)   # logit at the label index

        aux_v = aux_ref[...]                                   # (tile_n, 2) f32
        labels_col = aux_v[:, 1:2].astype(jnp.int32)           # (tile_n, 1)

        x = logits_ref[...].astype(jnp.float32)                # (tile_n, tile_c)
        # Narrow (1, tile_c) iota; the compares broadcast it across sublanes.
        col = jax.lax.broadcasted_iota(jnp.int32, (1, tile_c), 1) + j * tile_c
        if needs_col_mask:
            x = jnp.where(col < c, x, -jnp.inf)                # kill garbage columns

        # Label pick + chunk max share the same traversal of x.
        picked_chunk = jnp.max(jnp.where(col == labels_col, x, -jnp.inf),
                               axis=-1, keepdims=True)
        m_chunk = jnp.max(x, axis=-1, keepdims=True)

        # Online logsumexp update across class chunks.
        m_prev = m_sc[...]
        m_new = jnp.maximum(m_prev, m_chunk)
        l_sc[...] = (l_sc[...] * jnp.exp(m_prev - m_new)
                     + jnp.sum(jnp.exp(x - m_new), axis=-1, keepdims=True))
        m_sc[...] = m_new
        p_sc[...] = jnp.maximum(p_sc[...], picked_chunk)

        @pl.when(j == last_chunk)
        def _finalize():
            w = aux_v[:, 0:1]                                  # (tile_n, 1) f32
            lse = m_sc[...] + jnp.log(l_sc[...])
            per_row = (lse - p_sc[...]) * w
            if needs_row_mask:
                row = (jax.lax.broadcasted_iota(jnp.int32, (tile_n, 1), 0)
                       + i * tile_n)
                # Mask BEFORE summation so NaN/Inf from garbage rows cannot propagate.
                per_row = jnp.where(row < n, per_row, 0.0)
            out_ref[...] = jnp.broadcast_to(jnp.sum(per_row), out_ref.shape)

    # Explicit VMEM budget: 2x native logits tile (double-buffered input) + f32 upcast copy
    # + ~2 tile-sized f32 temps + aux/output/scratch.  Clamp to [16 MiB, 64 MiB] (v7x-safe).
    native_tile_bytes = tile_n * tile_c * itemsize
    f32_tile_bytes = tile_n * tile_c * 4
    est_bytes = (2 * native_tile_bytes + 3 * f32_tile_bytes
                 + 2 * _SUBLANES * _LANES * 4 + 2 * tile_n * 2 * 4 + 3 * tile_n * 4)
    vmem_limit_bytes = int(min(64 * 2 ** 20, max(16 * 2 ** 20, int(est_bytes * 1.25))))

    partials = pl.pallas_call(
        kernel,
        out_shape=jax.ShapeDtypeStruct((num_tiles * _SUBLANES, _LANES), jnp.float32),
        grid=(num_tiles, num_c_chunks),
        in_specs=[
            pl.BlockSpec((tile_n, tile_c), lambda i, j: (i, j)),   # logits, native dtype
            pl.BlockSpec((tile_n, 2), lambda i, j: (i, 0)),        # packed weights/labels
        ],
        out_specs=pl.BlockSpec((_SUBLANES, _LANES), lambda i, j: (i, 0)),
        scratch_shapes=[
            pltpu.VMEM((tile_n, 1), jnp.float32),   # running max
            pltpu.VMEM((tile_n, 1), jnp.float32),   # running exp-sum
            pltpu.VMEM((tile_n, 1), jnp.float32),   # picked label logit
        ],
        compiler_params=pltpu.CompilerParams(
            dimension_semantics=("parallel", "arbitrary"),
            vmem_limit_bytes=vmem_limit_bytes,
        ),
    )(outputs, aux)

    # Lane-dense partials; contiguous reshape (no strided gather), mean over the ORIGINAL N
    # (matches torch.mean(loss * weights), not F.cross_entropy's weight-normalized mean).
    total = partials.reshape(num_tiles, _SUBLANES, _LANES)[:, 0, 0].sum()
    return total / n


def _reference(outputs, labels, weights):
    # pure-JAX reference matching F.cross_entropy(reduction='none') * weights -> mean
    x = outputs.astype(jnp.float32)
    lse = logsumexp(x, axis=-1)
    picked = jnp.take_along_axis(x, labels[:, None].astype(jnp.int32), axis=-1)[:, 0]
    return jnp.mean((lse - picked) * weights.astype(jnp.float32))


if __name__ == "__main__":
    key = jax.random.PRNGKey(0)
    ks = jax.random.split(key, 12)

    def _check(res, ref, tol):
        assert jnp.allclose(res, ref, rtol=tol, atol=tol), (res, ref)

    # Test 1: tile-aligned small shape (single tile, single chunk).
    N, C = 8, 32
    out1 = jax.random.normal(ks[0], (N, C), dtype=jnp.float32)
    lab1 = jax.random.randint(ks[1], (N,), 0, C, dtype=jnp.int32)
    w1 = jax.random.uniform(ks[2], (N,), dtype=jnp.float32)
    r1 = weighted_cross_entropy_loss(out1, lab1, w1)
    jax.block_until_ready(r1)
    _check(r1, _reference(out1, lab1, w1), 1e-5)

    # Test 2: ragged batch + multiple row tiles (tiny tile budget forces 2 tiles, no host pad).
    N2, C2 = 13, 48
    out2 = jax.random.normal(ks[3], (N2, C2), dtype=jnp.float32)
    lab2 = jax.random.randint(ks[4], (N2,), 0, C2, dtype=jnp.int32)
    w2 = jax.random.uniform(ks[5], (N2,), dtype=jnp.float32)
    r2 = weighted_cross_entropy_loss(out2, lab2, w2, target_tile_bytes=1024)
    jax.block_until_ready(r2)
    _check(r2, _reference(out2, lab2, w2), 1e-5)

    # Test 3: chunked class dim (3 chunks, ragged last chunk) + ragged batch rows.
    N3, C3 = 13, 300
    out3 = jax.random.normal(ks[6], (N3, C3), dtype=jnp.float32)
    lab3 = jax.random.randint(ks[7], (N3,), 0, C3, dtype=jnp.int32)
    w3 = jax.random.uniform(ks[8], (N3,), dtype=jnp.float32)
    r3 = weighted_cross_entropy_loss(out3, lab3, w3, max_chunk_bytes=512)
    jax.block_until_ready(r3)
    _check(r3, _reference(out3, lab3, w3), 1e-5)

    # Test 4: bf16 logits (kernel and reference both upcast to f32).
    N4, C4 = 16, 128
    out4 = jax.random.normal(ks[9], (N4, C4), dtype=jnp.float32).astype(jnp.bfloat16)
    lab4 = jax.random.randint(ks[10], (N4,), 0, C4, dtype=jnp.int32)
    w4 = jax.random.uniform(ks[11], (N4,), dtype=jnp.float32)
    r4 = weighted_cross_entropy_loss(out4, lab4, w4)
    jax.block_until_ready(r4)
    _check(r4, _reference(out4, lab4, w4), 1e-4)

    print("KERNEL_OK")
</pallas_src>

<mosaic_0001>
module attributes {stable_mosaic.version = 11 : i64} {
  func.func @kernel(%arg0: i32, %arg1: i32, %arg2: memref<8x32xf32, #tpu.memory_space<vmem>>, %arg3: memref<8x2xf32, #tpu.memory_space<vmem>>, %arg4: memref<8x128xf32, #tpu.memory_space<vmem>>, %arg5: memref<8x1xf32, #tpu.memory_space<vmem>>, %arg6: memref<8x1xf32, #tpu.memory_space<vmem>>, %arg7: memref<8x1xf32, #tpu.memory_space<vmem>>) attributes {dimension_semantics = [#tpu.dimension_semantics<parallel>, #tpu.dimension_semantics<arbitrary>], iteration_bounds = array<i64: 1, 1>, scalar_prefetch = 0 : i64, scratch_operands = 3 : i64, tpu.core_type = #tpu.core_type<tc>, window_params = [{transform_indices = @transform_0, window_bounds = array<i64: 8, 32>}, {transform_indices = @transform_1, window_bounds = array<i64: 8, 2>}, {transform_indices = @transform_2, window_bounds = array<i64: 8, 128>}]} {
    %c0_i32 = arith.constant 0 : i32
    %0 = arith.cmpi eq, %arg1, %c0_i32 : i32
    %1 = arith.extui %0 : i1 to i32
    %c0_i32_0 = arith.constant 0 : i32
    %2 = arith.cmpi ne, %1, %c0_i32_0 : i32
    scf.if %2 {
      %cst_21 = arith.constant 0xFF800000 : f32
      %40 = vector.broadcast %cst_21 : f32 to vector<8x1xf32>
      %c0_22 = arith.constant 0 : index
      %c0_23 = arith.constant 0 : index
      %41 = vector.load %arg5[%c0_22, %c0_23] : memref<8x1xf32, #tpu.memory_space<vmem>>, vector<8x1xf32>
      tpu.vector_store %arg5[%c0_22, %c0_23], %40 {strides = array<i32>} : memref<8x1xf32, #tpu.memory_space<vmem>>, vector<8x1xf32>,
      %cst_24 = arith.constant 0.000000e+00 : f32
      %42 = vector.broadcast %cst_24 : f32 to vector<8x1xf32>
      %c0_25 = arith.constant 0 : index
      %c0_26 = arith.constant 0 : index
      %43 = vector.load %arg6[%c0_25, %c0_26] : memref<8x1xf32, #tpu.memory_space<vmem>>, vector<8x1xf32>
      tpu.vector_store %arg6[%c0_25, %c0_26], %42 {strides = array<i32>} : memref<8x1xf32, #tpu.memory_space<vmem>>, vector<8x1xf32>,
      %cst_27 = arith.constant 0xFF800000 : f32
      %44 = vector.broadcast %cst_27 : f32 to vector<8x1xf32>
      %c0_28 = arith.constant 0 : index
      %c0_29 = arith.constant 0 : index
      %45 = vector.load %arg7[%c0_28, %c0_29] : memref<8x1xf32, #tpu.memory_space<vmem>>, vector<8x1xf32>
      tpu.vector_store %arg7[%c0_28, %c0_29], %44 {strides = array<i32>} : memref<8x1xf32, #tpu.memory_space<vmem>>, vector<8x1xf32>,
    } else {
    }
    %c0 = arith.constant 0 : index
    %c0_1 = arith.constant 0 : index
    %3 = vector.load %arg3[%c0, %c0_1] : memref<8x2xf32, #tpu.memory_space<vmem>>, vector<8x2xf32>
    %4 = vector.extract_strided_slice %3 {offsets = [0, 1], sizes = [8, 1], strides = [1, 1]} : vector<8x2xf32> to vector<8x1xf32>
    %5 = arith.fptosi %4 : vector<8x1xf32> to vector<8x1xi32>
    %c0_2 = arith.constant 0 : index
    %c0_3 = arith.constant 0 : index
    %6 = vector.load %arg2[%c0_2, %c0_3] : memref<8x32xf32, #tpu.memory_space<vmem>>, vector<8x32xf32>
    %7 = tpu.iota {dimensions = array<i32: 1>} : vector<1x32xi32>
    %c32_i32 = arith.constant 32 : i32
    %8 = arith.muli %arg1, %c32_i32 : i32
    %9 = vector.broadcast %8 : i32 to vector<1x32xi32>
    %10 = arith.addi %7, %9 : vector<1x32xi32>
    %11 = vector.broadcast %10 : vector<1x32xi32> to vector<8x32xi32>
    %12 = vector.broadcast %5 : vector<8x1xi32> to vector<8x32xi32>
    %13 = arith.cmpi eq, %11, %12 : vector<8x32xi32>
    %cst = arith.constant 0xFF800000 : f32
    %14 = vector.broadcast %cst : f32 to vector<8x32xf32>
    %15 = arith.select %13, %6, %14 : vector<8x32xi1>, vector<8x32xf32>
    %cst_4 = arith.constant dense<0xFF800000> : vector<8xf32>
    %16 = vector.multi_reduction <maximumf>, %15, %cst_4 [1] : vector<8x32xf32> to vector<8xf32>
    %17 = vector.shape_cast %16 : vector<8xf32> to vector<8x1xf32>
    %cst_5 = arith.constant dense<0xFF800000> : vector<8xf32>
    %18 = vector.multi_reduction <maximumf>, %6, %cst_5 [1] : vector<8x32xf32> to vector<8xf32>
    %19 = vector.shape_cast %18 : vector<8xf32> to vector<8x1xf32>
    %c0_6 = arith.constant 0 : index
    %c0_7 = arith.constant 0 : index
    %20 = vector.load %arg5[%c0_6, %c0_7] : memref<8x1xf32, #tpu.memory_space<vmem>>, vector<8x1xf32>
    %21 = arith.maximumf %20, %19 : vector<8x1xf32>
    %c0_8 = arith.constant 0 : index
    %c0_9 = arith.constant 0 : index
    %22 = vector.load %arg6[%c0_8, %c0_9] : memref<8x1xf32, #tpu.memory_space<vmem>>, vector<8x1xf32>
    %23 = arith.subf %20, %21 : vector<8x1xf32>
    %24 = math.exp %23 : vector<8x1xf32>
    %25 = arith.mulf %22, %24 : vector<8x1xf32>
    %26 = vector.broadcast %21 : vector<8x1xf32> to vector<8x32xf32>
    %27 = arith.subf %6, %26 : vector<8x32xf32>
    %28 = math.exp %27 : vector<8x32xf32>
    %cst_10 = arith.constant dense<0.000000e+00> : vector<8xf32>
    %29 = vector.multi_reduction <add>, %28, %cst_10 [1] : vector<8x32xf32> to vector<8xf32>
    %30 = vector.shape_cast %29 : vector<8xf32> to vector<8x1xf32>
    %31 = arith.addf %25, %30 : vector<8x1xf32>
    %c0_11 = arith.constant 0 : index
    %c0_12 = arith.constant 0 : index
    %32 = vector.load %arg6[%c0_11, %c0_12] : memref<8x1xf32, #tpu.memory_space<vmem>>, vector<8x1xf32>
    tpu.vector_store %arg6[%c0_11, %c0_12], %31 {strides = array<i32>} : memref<8x1xf32, #tpu.memory_space<vmem>>, vector<8x1xf32>,
    %c0_13 = arith.constant 0 : index
    %c0_14 = arith.constant 0 : index
    %33 = vector.load %arg5[%c0_13, %c0_14] : memref<8x1xf32, #tpu.memory_space<vmem>>, vector<8x1xf32>
    tpu.vector_store %arg5[%c0_13, %c0_14], %21 {strides = array<i32>} : memref<8x1xf32, #tpu.memory_space<vmem>>, vector<8x1xf32>,
    %c0_15 = arith.constant 0 : index
    %c0_16 = arith.constant 0 : index
    %34 = vector.load %arg7[%c0_15, %c0_16] : memref<8x1xf32, #tpu.memory_space<vmem>>, vector<8x1xf32>
    %35 = arith.maximumf %34, %17 : vector<8x1xf32>
    %c0_17 = arith.constant 0 : index
    %c0_18 = arith.constant 0 : index
    %36 = vector.load %arg7[%c0_17, %c0_18] : memref<8x1xf32, #tpu.memory_space<vmem>>, vector<8x1xf32>
    tpu.vector_store %arg7[%c0_17, %c0_18], %35 {strides = array<i32>} : memref<8x1xf32, #tpu.memory_space<vmem>>, vector<8x1xf32>,
    %c0_i32_19 = arith.constant 0 : i32
    %37 = arith.cmpi eq, %arg1, %c0_i32_19 : i32
    %38 = arith.extui %37 : i1 to i32
    %c0_i32_20 = arith.constant 0 : i32
    %39 = arith.cmpi ne, %38, %c0_i32_20 : i32
    scf.if %39 {
      %40 = vector.extract_strided_slice %3 {offsets = [0, 0], sizes = [8, 1], strides = [1, 1]} : vector<8x2xf32> to vector<8x1xf32>
      %c0_21 = arith.constant 0 : index
      %c0_22 = arith.constant 0 : index
      %41 = vector.load %arg5[%c0_21, %c0_22] : memref<8x1xf32, #tpu.memory_space<vmem>>, vector<8x1xf32>
      %c0_23 = arith.constant 0 : index
      %c0_24 = arith.constant 0 : index
      %42 = vector.load %arg6[%c0_23, %c0_24] : memref<8x1xf32, #tpu.memory_space<vmem>>, vector<8x1xf32>
      %43 = math.log %42 : vector<8x1xf32>
      %44 = arith.addf %41, %43 : vector<8x1xf32>
      %c0_25 = arith.constant 0 : index
      %c0_26 = arith.constant 0 : index
      %45 = vector.load %arg7[%c0_25, %c0_26] : memref<8x1xf32, #tpu.memory_space<vmem>>, vector<8x1xf32>
      %46 = arith.subf %44, %45 : vector<8x1xf32>
      %47 = arith.mulf %46, %40 : vector<8x1xf32>
      %48 = vector.shape_cast %47 : vector<8x1xf32> to vector<1x8x1xf32>
      %cst_27 = arith.constant dense<0.000000e+00> : vector<1xf32>
      %49 = vector.multi_reduction <add>, %48, %cst_27 [1, 2] : vector<1x8x1xf32> to vector<1xf32>
      %50 = vector.shape_cast %49 : vector<1xf32> to vector<1x1x1xf32>
      %51 = vector.extract %50[0, 0, 0] : f32 from vector<1x1x1xf32>
      %52 = vector.broadcast %51 : f32 to vector<8x128xf32>
      %c0_28 = arith.constant 0 : index
      %c0_29 = arith.constant 0 : index
      %53 = vector.load %arg4[%c0_28, %c0_29] : memref<8x128xf32, #tpu.memory_space<vmem>>, vector<8x128xf32>
      tpu.vector_store %arg4[%c0_28, %c0_29], %52 {strides = array<i32>} : memref<8x128xf32, #tpu.memory_space<vmem>>, vector<8x128xf32>,
    } else {
    }
    return
  }
  func.func @transform_0(%arg0: i32, %arg1: i32) -> (i32, i32) {
    %c0_i32 = arith.constant 0 : i32
    return %arg0, %arg1 : i32, i32
  }
  func.func @transform_1(%arg0: i32, %arg1: i32) -> (i32, i32) {
    %c0_i32 = arith.constant 0 : i32
    %c0_i32_0 = arith.constant 0 : i32
    return %arg0, %c0_i32 : i32, i32
  }
  func.func @transform_2(%arg0: i32, %arg1: i32) -> (i32, i32) {
    %c0_i32 = arith.constant 0 : i32
    %c0_i32_0 = arith.constant 0 : i32
    return %arg0, %c0_i32 : i32, i32
  }
}

</mosaic_0001>

<bundles_post_ra>
// kernel: tpu_custom_call.1
= control target key start
LH: loop header
LB: loop body
LE: loop exit
PB: predicated region body
PF: predicated region fallthrough
CT: control target
= control target key end

     0   :  { %vm33_vm0 = vcmask 261120   ;;  %s189_s0 = inlined_call_operand.vmem [shape: f32[8,32], index: 0, kind: input, shape index: {}]   ;;  %s190_s1 = inlined_call_operand.vmem [shape: f32[8,2], index: 1, kind: input, shape index: {}]   ;;  %s191_s2 = inlined_call_operand.hbm [shape: f32[8,128], index: 2, kind: output, shape index: {}]  }
   0x1   :  { %v22_v0 = vld [vmem:[%s189_s0] sm:$0xff] }
   0x2   :  { %7 = vsyncpa [#allocation6], 0  ;;  %v37_v1 = vsel %vm33_vm0, %v22_v0, -inf  ;;  %vm16_vm1 = vcmask 7168   ;;  %v150_v2 = vmov -inf   ;;  %v151_v3 = vmov 0  }
   0x3   :  { %38 = vmax.xlane.f32.xlu0 %v37_v1  ;;  %17 = vst.msk [vmem:[#allocation2] sm:$0xff] %vm16_vm1, %v150_v2  ;;  %v152_v4 = vmov 0.0   ;;  %v20_v5 = vld [vmem:[%s190_s1] sm:$0xff]  ;;  %v153_v6 = vmov 1   ;;  %v23_v15 = vlaneseq  ;;  %s154_s0 = smov [#allocation5]   ;;  %s95_s15 = sshll.u32 %s191_s2, 4  ;;  %s96_s15 = int_to_ptr.hbm [resolvable:$true] %s95_s15 }
   0x4   :  { %19 = vst.msk [vmem:[#allocation4] sm:$0xff] %vm16_vm1, %v150_v2  ;;  %116 = vset.pattern.permute.xlu0 %v151_v3  ;;  %117 = vset.pattern.permute.xlu1 %v153_v6  ;;  %vm104_vm2 = vcmp.lt.s32.totalorder %v20_v5, 0  ;;  %v105_v7 = vceil.f32 %v20_v5  ;;  %v106_v8 = vfloor.f32 %v20_v5  ;;  %s93_s1 = sshll.u32 %s154_s0, 4  ;;  %s94_s1 = int_to_ptr.vmem [resolvable:$true] %s93_s1 }
   0x5   :  { %18 = vst.msk [vmem:[#allocation3] sm:$0xff] %vm16_vm1, %v152_v4  ;;  %v24_v17 = vand.u32 127, %v23_v15 }
   0x6   :  { %v107_v9 = vsel %vm104_vm2, %v105_v7, %v106_v8 }
   0x7   :  { %v108_v10 = vcvt.f32.s32 %v107_v9 }
   0x9   :  { %29 = vperm.xlu1 %117, %v108_v10  }
   0xa   :  { %v40_v11 = vld [vmem:[#allocation2] sm:$0xff] }
   0xb   :  { %v62_v25 = vld [vmem:[#allocation4] sm:$0xff] }
   0xc   :  { %v42_v30 = vld [vmem:[#allocation3] sm:$0xff] }
  0x76   :  { %v39_v12 = vpop.xlane.xlu0 %38 }
  0x77   :  { %v41_v13 = vmax.f32 %v40_v11, %v39_v12 }
  0x79   :  { %v43_v14 = vsub.f32 %v40_v11, %v41_v13  ;;  %61 = vst.msk [vmem:[#allocation2] sm:$0xff] %vm16_vm1, %v41_v13  ;;  %49 = vperm.xlu0 %116, %v41_v13  }
  0x7b   :  { %v30_v16 = vpop.permute.xlu1 %29  ;;  %v44_v28 = vmul.f32 1.442695, %v43_v14 }
  0x7c   :  { %vm31_vm3 = vcmp.eq.s32.totalorder %v24_v17, %v30_v16 }
  0x7d   :  { %v32_v18 = vsel %vm31_vm3, %v22_v0, -inf }
  0x7e   :  { %v34_v19 = vsel %vm33_vm0, %v32_v18, -inf }
  0x7f   :  { %35 = vmax.xlane.f32.xlu2 %v34_v19 }
  0x80   :  { %v68_v37 = vld [vmem:[#allocation2] sm:$0xff] }
  0xeb   :  { %v50_v20 = vpop.permute.xlu0 %49 }
  0xec   :  { %v52_v21 = vsub.f32 %v22_v0, %v50_v20 }
  0xee   :  { %v53_v22 = vmul.f32 1.442695, %v52_v21 }
  0xf0   :  { %118 = vpow2.f32 %v53_v22 }
  0xf1   :  { %120 = vpow2.f32 %v44_v28 }
  0xf2   :  { %v36_v26 = vpop.xlane.xlu2 %35 }
  0xf3   :  { %v63_v27 = vmax.f32 %v62_v25, %v36_v26 }
  0xf5   :  { %64 = vst.msk [vmem:[#allocation4] sm:$0xff] %vm16_vm1, %v63_v27 }
  0xf6   :  { %v119_v23 = vpop.eup %118 }
  0xf7   :  { %v55_v24 = vsel %vm33_vm0, %v119_v23, 0.0  ;;  %v121_v29 = vpop.eup %120 }
  0xf8   :  { %56 = vadd.xlane.f32.xlu1 %v55_v24  ;;  %v46_v31 = vmul.f32 %v121_v29, %v42_v30 }
  0xfc   :  { %v73_v38 = vld [vmem:[#allocation4] sm:$0xff] }
 0x16b   :  { %v57_v32 = vpop.xlane.xlu1 %56 }
 0x16c   :  { %v58_v33 = vadd.f32 %v57_v32, %v46_v31 }
 0x16e   :  { %60 = vst.msk [vmem:[#allocation3] sm:$0xff] %vm16_vm1, %v58_v33 }
 0x175   :  { %v69_v34 = vld [vmem:[#allocation3] sm:$0xff] }
 0x176   :  { %122 = vlog2.f32 %v69_v34 }
 0x17c   :  { %v123_v35 = vpop.eup %122 }
 0x17d   :  { %v71_v36 = vmul.f32 0.6931472, %v123_v35 }
 0x17f   :  { %v72_v39 = vadd.f32 %v71_v36, %v68_v37 }
 0x181   :  { %v74_v40 = vsub.f32 %v72_v39, %v73_v38 }
 0x183   :  { %v75_v41 = vmul.f32 %v74_v40, %v20_v5 }
 0x185   :  { %v76_v42 = vsel %vm16_vm1, %v75_v41, 0.0 }
 0x186   :  { %77 = vadd.xlane.f32.xlu2 %v76_v42 }
 0x1f9   :  { %v78_v43 = vpop.xlane.xlu2 %77 }
 0x1fa   :  { %v79_v44 = vrot.slane %v78_v43, 4 }
 0x1fc   :  { %v80_v45 = vadd.f32 %v79_v44, %v78_v43 }
 0x1fe   :  { %v81_v46 = vrot.slane %v80_v45, 2 }
 0x200   :  { %v82_v47 = vadd.f32 %v81_v46, %v80_v45 }
 0x202   :  { %v83_v48 = vrot.slane %v82_v47, 1 }
 0x204   :  { %v84_v49 = vadd.f32 %v83_v48, %v82_v47 }
 0x206   :  { %109 = vpush %v84_v49 }
 0x237   :  { %s110_s16 = spop %109 }
 0x238   :  { %v86_v50 = vstv %s110_s16 }
 0x239   :  { %87 = vst [vmem:[#allocation5] sm:$0xff] %v86_v50 }
 0x23a   :  { %98 = dma.vmem_to_hbm [thread:$0]  %s94_s1, 128, %s96_s15, [#allocation6]  }
 0x23b   :  { %148 = dma.done.wait [#allocation6], 128  }
 0x23c   :  { %149 = vsyncadd [#allocation6], 4294967168 }
 0x23d   :  { %103 = vsyncpa [#allocation6], 1 }

</bundles_post_ra>
